<compile_context>
chip_gen: v7x
topology: tpu7x:2x2x1
jax: 0.10.0
libtpu: 0.0.40
codegen_flags: <defaults>
</compile_context>

<pallas_src>
import jax
import jax.numpy as jnp
from jax.experimental import pallas as pl
from jax.experimental.pallas import tpu as pltpu


def _rayleigh_kernel(scal_ref, x_ref, o_ref):
    # scal_ref: SMEM (2,) f32 = [1/sigma^2, -0.5/sigma^2]
    # x_ref/o_ref: VMEM tiles in the original dtype
    inv_s2 = scal_ref[0]
    neg_half_inv_s2 = scal_ref[1]
    x = x_ref[...].astype(jnp.float32)
    y = x * inv_s2 * jnp.exp((x * x) * neg_half_inv_s2)
    o_ref[...] = y.astype(o_ref.dtype)


def rayleigh_forward(x, sigma):
    """Apply the Rayleigh kernel elementwise to x (any shape), scalar sigma."""
    orig_shape = x.shape
    orig_dtype = x.dtype
    xf = x.reshape(-1)                      # keep original dtype; cast in-kernel
    total = xf.shape[0]

    # Lane-dense 2D layout: pick the widest C (multiple of 128) dividing total.
    LANE = 128
    C = None
    for cand in (4096, 2048, 1024, 512, 256, 128):
        if total % cand == 0:
            C = cand
            break
    if C is None:
        # small tail pad (< 128 elements) only when nothing divides
        pad = (-total) % LANE
        xf = jnp.pad(xf, (0, pad))
        C = LANE
    rows = xf.shape[0] // C
    x2d = xf.reshape(rows, C)

    # ~2 MiB (f32-equivalent) blocks: big enough to amortize per-step overhead
    # and hit HBM roofline, small enough that (in+out) x 2 buffers fits the
    # scoped-VMEM budget on every generation (tightest on v7x).
    target_elems = (2 * 1024 * 1024) // 4
    tile_r = max(8, (target_elems // C) // 8 * 8)
    if tile_r >= rows:
        tile_r = rows                        # full extent is always legal
    grid = (pl.cdiv(rows, tile_r),)

    scal = jnp.asarray(
        [1.0 / (sigma * sigma), -0.5 / (sigma * sigma)], dtype=jnp.float32
    )

    out2d = pl.pallas_call(
        _rayleigh_kernel,
        out_shape=jax.ShapeDtypeStruct((rows, C), orig_dtype),
        grid=grid,
        in_specs=[
            pl.BlockSpec(memory_space=pltpu.SMEM),            # scalar constants
            pl.BlockSpec((tile_r, C), lambda i: (i, 0)),      # x tile
        ],
        out_specs=pl.BlockSpec((tile_r, C), lambda i: (i, 0)),
        compiler_params=pltpu.CompilerParams(
            dimension_semantics=("parallel",),                # 2-TC shard on v7x
            vmem_limit_bytes=32 * 1024 * 1024,
        ),
    )(scal, x2d)

    out = out2d.reshape(-1)[:total].reshape(orig_shape)
    return out


def rayleigh_ref(x, sigma):
    x = x.astype(jnp.float32)
    return x / (sigma ** 2) * jnp.exp(-(x ** 2) / 2.0 / (sigma ** 2))


if __name__ == "__main__":
    key = jax.random.PRNGKey(0)
    # Deterministic parameter init (module __init__ takes a scalar Sigma).
    Sigma = 1.5

    # Primary small NCHW input consistent with the elementwise forward.
    x = jax.random.normal(key, (2, 4, 16, 16), dtype=jnp.float32)
    y = jax.block_until_ready(rayleigh_forward(x, Sigma))
    y_ref = rayleigh_ref(x, Sigma)
    assert y.shape == x.shape and y.dtype == x.dtype
    assert jnp.allclose(y, y_ref, atol=1e-5, rtol=1e-5)

    # Multi-tile path: exercises grid > 1 and double-buffered pipelining.
    key, k2, k3 = jax.random.split(key, 3)
    x2 = jax.random.normal(k2, (16, 32, 64, 64), dtype=jnp.float32)
    y2 = jax.block_until_ready(rayleigh_forward(x2, Sigma))
    assert jnp.allclose(y2, rayleigh_ref(x2, Sigma), atol=1e-5, rtol=1e-5)

    # Ragged-size bf16 input: exercises in-kernel upcast/downcast and tail pad.
    x3 = jax.random.normal(k3, (3, 5, 37, 29), dtype=jnp.bfloat16)
    y3 = jax.block_until_ready(rayleigh_forward(x3, Sigma))
    assert y3.shape == x3.shape and y3.dtype == jnp.bfloat16
    ref3 = rayleigh_ref(x3, Sigma)
    assert jnp.allclose(y3.astype(jnp.float32), ref3, atol=2e-2, rtol=2e-2)

    print("KERNEL_OK")
</pallas_src>

<mosaic_0001>
module attributes {stable_mosaic.version = 11 : i64} {
  func.func @_rayleigh_kernel(%arg0: i32, %arg1: memref<2xf32, #tpu.memory_space<smem>>, %arg2: memref<1x2048xf32, #tpu.memory_space<vmem>>, %arg3: memref<1x2048xf32, #tpu.memory_space<vmem>>) attributes {dimension_semantics = [#tpu.dimension_semantics<parallel>], iteration_bounds = array<i64: 1>, scalar_prefetch = 0 : i64, scratch_operands = 0 : i64, tpu.core_type = #tpu.core_type<tc>, window_params = [{transform_indices = @transform_0, window_bounds = array<i64: 2>}, {transform_indices = @transform_1, window_bounds = array<i64: 1, 2048>}, {transform_indices = @transform_2, window_bounds = array<i64: 1, 2048>}]} {
    %c0 = arith.constant 0 : index
    %0 = memref.load %arg1[%c0] : memref<2xf32, #tpu.memory_space<smem>>
    %c1 = arith.constant 1 : index
    %1 = memref.load %arg1[%c1] : memref<2xf32, #tpu.memory_space<smem>>
    %c0_0 = arith.constant 0 : index
    %c0_1 = arith.constant 0 : index
    %2 = vector.load %arg2[%c0_0, %c0_1] : memref<1x2048xf32, #tpu.memory_space<vmem>>, vector<1x2048xf32>
    %3 = vector.broadcast %0 : f32 to vector<1x2048xf32>
    %4 = arith.mulf %2, %3 : vector<1x2048xf32>
    %5 = arith.mulf %2, %2 : vector<1x2048xf32>
    %6 = vector.broadcast %1 : f32 to vector<1x2048xf32>
    %7 = arith.mulf %5, %6 : vector<1x2048xf32>
    %8 = math.exp %7 : vector<1x2048xf32>
    %9 = arith.mulf %4, %8 : vector<1x2048xf32>
    %c0_2 = arith.constant 0 : index
    %c0_3 = arith.constant 0 : index
    %10 = vector.load %arg3[%c0_2, %c0_3] : memref<1x2048xf32, #tpu.memory_space<vmem>>, vector<1x2048xf32>
    tpu.vector_store %arg3[%c0_2, %c0_3], %9 {strides = array<i32>} : memref<1x2048xf32, #tpu.memory_space<vmem>>, vector<1x2048xf32>,
    return
  }
  func.func @transform_0(%arg0: i32) -> i32 {
    %c0_i32 = arith.constant 0 : i32
    %c0_i32_0 = arith.constant 0 : i32
    return %c0_i32 : i32
  }
  func.func @transform_1(%arg0: i32) -> (i32, i32) {
    %c0_i32 = arith.constant 0 : i32
    %c0_i32_0 = arith.constant 0 : i32
    return %arg0, %c0_i32 : i32, i32
  }
  func.func @transform_2(%arg0: i32) -> (i32, i32) {
    %c0_i32 = arith.constant 0 : i32
    %c0_i32_0 = arith.constant 0 : i32
    return %arg0, %c0_i32 : i32, i32
  }
}

</mosaic_0001>

<bundles_post_ra>
// kernel: tpu_custom_call.1
= control target key start
LH: loop header
LB: loop body
LE: loop exit
PB: predicated region body
PF: predicated region fallthrough
CT: control target
= control target key end

     0   :  { %7 = vsyncpa [#allocation5], 0  ;;  %s193_s0 = inlined_call_operand.hbm [shape: f32[2], index: 0, kind: input, shape index: {}]   ;;  %s194_s1 = inlined_call_operand.hbm [shape: f32[1,2048], index: 1, kind: input, shape index: {}]   ;;  %s195_s2 = inlined_call_operand.hbm [shape: f32[1,2048], index: 2, kind: output, shape index: {}]  }
   0x1   :  { %8 = vsyncpa [#allocation3], 0 }
   0x2   :  { %9 = vsyncpa [#allocation4], 0  ;;  %s79_s11 = scalar_lea.hbm %s193_s0, 16 }
   0x3   :  { %p80_p0 = scmp.ne.s32.totalorder %s193_s0, %s79_s11  ;;  %p83_p1 = scmp.lt.u32.totalorder %s79_s11, %s193_s0 }
   0x5   :  { %p85_p2 = pnand %p83_p1, %p80_p0 }
   0x7   :  { %88 = shalt.err (!%p85_p2)
}
   0x8   :  { %s139_s16 = smov [#allocation2]   ;;  %s140_s19 = smov [#allocation6]  }
   0x9   :  { %17 = dma.hbm_to_smem %s193_s0, 16, %s139_s16, [#allocation5]  }
   0xa   :  { %s24_s20 = sshll.u32 %s140_s19, 4  ;;  %s89_s23 = scalar_lea.hbm %s194_s1, 256  ;;  %s25_s20 = int_to_ptr.vmem [resolvable:$true] %s24_s20 }
   0xb   :  { %p90_p3 = scmp.ne.s32.totalorder %s194_s1, %s89_s23  ;;  %p93_p4 = scmp.lt.u32.totalorder %s89_s23, %s194_s1 }
   0xd   :  { %p95_p5 = pnand %p93_p4, %p90_p3 }
   0xf   :  { %98 = shalt.err (!%p95_p5)
}
  0x10   :  { %s99_s28 = scalar_lea.vmem %s25_s20, 256  ;;  %p104_p7 = scmp.lt.s32.totalorder %s25_s20, %s25_s20 }
  0x11   :  { %p100_p6 = scmp.ne.s32.totalorder %s25_s20, %s99_s28  ;;  %p105_p8 = scmp.lt.s32.totalorder %s99_s28, %s99_s28 }
  0x13   :  { %p106_p9 = por %p105_p8, %p104_p7 }
  0x15   :  { %p107_p10 = pnand %p106_p9, %p100_p6 }
  0x17   :  { %110 = shalt.err (!%p107_p10)
}
  0x18   :  { %27 = dma.hbm_to_vmem [thread:$0]  %s194_s1, 256, %s25_s20, [#allocation3]  }
  0x19   :  { %133 = dma.done.wait [#allocation5], 16  }
  0x1a   :  { %134 = vsyncadd [#allocation5], 4294967280 }
  0x1b   :  { %135 = dma.done.wait [#allocation3], 256  }
  0x1c   :  { %136 = vsyncadd [#allocation3], 4294967040 }
  0x1d   :  { %34 = sfence }
  0x1e   :  { %s71_s30 = sld [smem:[#allocation2 + $0x1]]  ;;  %v37_v0 = vld [vmem:[#allocation6] sm:$0xff]  ;;  %v38_v1 = vld [vmem:[#allocation6 + $0x8] sm:$0xff]  ;;  %s35_s3 = sld [smem:[#allocation2]] }
  0x1f   :  { %v42_v2 = vmul.f32 %v37_v0, %v37_v0  ;;  %v43_v3 = vmul.f32 %v38_v1, %v38_v1  ;;  %s141_s1 = smov [#allocation7]  }
  0x20   :  { %s61_s4 = sshll.u32 %s141_s1, 4  ;;  %s62_s4 = int_to_ptr.vmem [resolvable:$true] %s61_s4 }
  0x21   :  { %s111_s5 = scalar_lea.vmem %s62_s4, 256  ;;  %p116_p12 = scmp.lt.s32.totalorder %s62_s4, %s62_s4 }
  0x22   :  { %p112_p11 = scmp.ne.s32.totalorder %s62_s4, %s111_s5  ;;  %p117_p13 = scmp.lt.s32.totalorder %s111_s5, %s111_s5 }
  0x24   :  { %v44_v4 = vstv %s71_s30  ;;  %v39_v9 = vstv %s35_s3  ;;  %p118_p0 = por %p117_p13, %p116_p12 }
  0x25   :  { %v45_v5 = vmul.f32 %v44_v4, %v42_v2  ;;  %v46_v6 = vmul.f32 %v44_v4, %v43_v3  ;;  %v40_v10 = vmul.f32 %v39_v9, %v37_v0  ;;  %v41_v11 = vmul.f32 %v39_v9, %v38_v1 }
  0x26   :  { %p119_p1 = pnand %p118_p0, %p112_p11 }
  0x27   :  { %v47_v7 = vmul.f32 1.442695, %v45_v5  ;;  %v49_v8 = vmul.f32 1.442695, %v46_v6 }
  0x29   :  { %75 = vpow2.f32 %v47_v7 }
  0x2a   :  { %77 = vpow2.f32 %v49_v8 }
  0x33   :  { %v76_v12 = vpop.eup %75 }
  0x34   :  { %v78_v13 = vpop.eup %77  ;;  %v51_v14 = vmul.f32 %v76_v12, %v40_v10 }
  0x35   :  { %v52_v15 = vmul.f32 %v78_v13, %v41_v11 }
  0x36   :  { %53 = vst [vmem:[#allocation7] sm:$0xff] %v51_v14 }
  0x37   :  { %54 = vst [vmem:[#allocation7 + $0x8] sm:$0xff] %v52_v15 }
  0x38   :  { %122 = shalt.err (!%p119_p1)
}
  0x39   :  { %s123_s8 = scalar_lea.hbm %s195_s2, 256 }
  0x3a   :  { %p124_p2 = scmp.ne.s32.totalorder %s195_s2, %s123_s8  ;;  %p127_p3 = scmp.lt.u32.totalorder %s123_s8, %s195_s2 }
  0x3c   :  { %p129_p4 = pnand %p127_p3, %p124_p2 }
  0x3e   :  { %132 = shalt.err (!%p129_p4)
}
  0x3f   :  { %64 = dma.vmem_to_hbm [thread:$0]  %s62_s4, 256, %s195_s2, [#allocation4]  }
  0x40   :  { %137 = dma.done.wait [#allocation4], 256  }
  0x41   :  { %138 = vsyncadd [#allocation4], 4294967040 }
  0x42   :  { %68 = vsyncpa [#allocation3], 1 }
  0x43   :  { %69 = vsyncpa [#allocation4], 1 }
  0x44   :  { %70 = vsyncpa [#allocation5], 1 }

</bundles_post_ra>
